<compile_context>
chip_gen: v7x
topology: tpu7x:2x2x1
jax: 0.10.0
libtpu: 0.0.40
codegen_flags: <defaults>
</compile_context>

<pallas_src>
import math

import numpy as np

import jax
import jax.numpy as jnp
from jax.experimental import pallas as pl
from jax.experimental.pallas import tpu as pltpu

IGNORE_LABEL = 255
THRESH = 0.7                              # probability threshold; loss thresh = -log(0.7)
AUX_WEIGHTS = [1, 1]
_LOSS_THRESH = float(-math.log(THRESH))


def _make_ce_kernel(t, hw, thresh):
    """Builds the per-tile CE + OHEM-partials kernel (closes over static sizes)."""

    def kernel(logits_ref, labels_ref, loss_ref, stats_ref):
        # logits_ref: (1, C, T)   labels_ref: (1, 1, T)
        # loss_ref:   (1, 1, T)   stats_ref:  (1, 1, 1, 128)
        x = logits_ref[...].astype(jnp.float32)            # f32 math even for bf16 inputs
        lbl = labels_ref[...]

        # Numerically stable log-sum-exp over channels (sublane axis).
        m = jnp.max(x, axis=1, keepdims=True)                               # (1, 1, T)
        lse = m + jnp.log(jnp.sum(jnp.exp(x - m), axis=1, keepdims=True))   # (1, 1, T)

        # Gather the target-class logit via a one-hot mask (channels on sublanes).
        class_ids = jax.lax.broadcasted_iota(jnp.int32, x.shape, 1)
        onehot = (class_ids == lbl).astype(jnp.float32)
        picked = jnp.sum(x * onehot, axis=1, keepdims=True)                 # (1, 1, T)

        # Validity: not ignore_label and not in the ragged tail of the last tile.
        pix = (jax.lax.broadcasted_iota(jnp.int32, lbl.shape, 2)
               + pl.program_id(1) * t)
        valid = (lbl != IGNORE_LABEL) & (pix < hw)
        loss = jnp.where(valid, lse - picked, 0.0)
        loss_ref[...] = loss

        # Per-block OHEM partials: [n_valid, n_hard, sum_hard] on lanes 0..2.
        hard = valid & (loss > thresh)
        n_valid = jnp.sum(valid.astype(jnp.float32))
        n_hard = jnp.sum(hard.astype(jnp.float32))
        s_hard = jnp.sum(jnp.where(hard, loss, 0.0))

        lane = jax.lax.broadcasted_iota(jnp.int32, stats_ref.shape, 3)
        stats_ref[...] = jnp.where(
            lane == 0, n_valid,
            jnp.where(lane == 1, n_hard,
                      jnp.where(lane == 2, s_hard, 0.0)))

    return kernel


def per_pixel_ce(logits_nchw, labels_nhw, tile_hw=8192):
    """Per-pixel cross entropy + fused per-block OHEM partials.

    Returns (loss[P] f32, n_valid i32, count_hard i32, sum_hard f32), P = N*H*W.
    """
    n, c, h, w = logits_nchw.shape
    hw = h * w

    logits = logits_nchw.reshape(n, c, hw)                  # free reshape, no HBM copy
    labels = labels_nhw.reshape(n, 1, hw).astype(jnp.int32)

    # Pixel tile: full pixel axis if it fits, otherwise a multiple of 128 lanes;
    # the ragged tail of the last tile is masked inside the kernel (no jnp.pad).
    if hw <= tile_hw:
        t = hw
    else:
        t = max(128, (tile_hw // 128) * 128)
    n_tiles = pl.cdiv(hw, t)

    kernel = _make_ce_kernel(t, hw, _LOSS_THRESH)

    loss, stats = pl.pallas_call(
        kernel,
        out_shape=(
            jax.ShapeDtypeStruct((n, 1, hw), jnp.float32),
            jax.ShapeDtypeStruct((n, n_tiles, 1, 128), jnp.float32),
        ),
        grid=(n, n_tiles),
        in_specs=[
            pl.BlockSpec((1, c, t), lambda b, j: (b, 0, j)),
            pl.BlockSpec((1, 1, t), lambda b, j: (b, 0, j)),
        ],
        out_specs=(
            pl.BlockSpec((1, 1, t), lambda b, j: (b, 0, j)),
            pl.BlockSpec((1, 1, 1, 128), lambda b, j: (b, j, 0, 0)),
        ),
        compiler_params=pltpu.CompilerParams(
            dimension_semantics=("parallel", "parallel")),
        # Default scoped VMEM easily covers a (1, C, 8192) f32 block double-buffered;
        # raise vmem_limit_bytes only if tile_hw is pushed well past ~16K px with big C.
    )(logits, labels)

    # Per-block counts are exact integers in f32 (block <= 8192 px); cast before
    # the global sum so huge images (>= 2^24 px) stay exact.
    n_valid = stats[..., 0].astype(jnp.int32).sum()
    count_hard = stats[..., 1].astype(jnp.int32).sum()
    sum_hard = stats[..., 2].sum()
    return loss.reshape(n * hw), n_valid, count_hard, sum_hard


def _ohem_single(logits_nchw, labels_nhw):
    """Equivalent of OhemCrossEntropy._forward for a single prediction."""
    loss, n_valid, count_hard, sum_hard = per_pixel_ce(logits_nchw, labels_nhw)
    n_min = n_valid // 16

    def mean_hard(args):
        _, s_hard, c_hard = args
        # c_hard >= 1 guaranteed by the predicate; maximum() is belt-and-braces.
        return s_hard / jnp.maximum(c_hard.astype(jnp.float32), 1.0)

    def topk_fallback(args):
        loss_v, _, _ = args
        # Guard k >= 1 so an all-ignored input yields 0.0 instead of NaN (0/0).
        k = jnp.maximum(n_min, 1)
        loss_sorted = jnp.sort(loss_v)[::-1]                # descending
        idx = jnp.arange(loss_v.shape[0], dtype=jnp.int32)
        return jnp.sum(jnp.where(idx < k, loss_sorted, 0.0)) / k.astype(jnp.float32)

    # PyTorch: use loss[loss > thresh] when it has >= n_min entries, else topk(n_min).
    use_hard = (count_hard >= n_min) & (count_hard > 0)
    return jax.lax.cond(use_hard, mean_hard, topk_fallback,
                        (loss, sum_hard, count_hard))


def ohem_cross_entropy(preds, labels):
    """Equivalent of OhemCrossEntropy.forward (weight=None, thresh=0.7)."""
    if isinstance(preds, (tuple, list)):
        total = 0.0
        for pred, wgt in zip(preds, AUX_WEIGHTS):
            total = total + wgt * _ohem_single(pred, labels)
        return total
    return _ohem_single(preds, labels)


# ----------------------------- numpy reference ------------------------------

def _ref_single(logits, labels):
    x = np.asarray(logits, np.float64)
    y = np.asarray(labels)
    n, c, h, w = x.shape
    xf = x.transpose(0, 2, 3, 1).reshape(-1, c)
    yf = y.reshape(-1)
    m = xf.max(-1, keepdims=True)
    lse = (m + np.log(np.exp(xf - m).sum(-1, keepdims=True)))[:, 0]
    safe = np.where(yf == IGNORE_LABEL, 0, yf)
    picked = xf[np.arange(xf.shape[0]), safe]
    loss = np.where(yf == IGNORE_LABEL, 0.0, lse - picked)
    n_min = int((yf != IGNORE_LABEL).sum()) // 16
    hard = loss[loss > _LOSS_THRESH]
    if hard.size < n_min:
        k = max(n_min, 1)
        hard = np.sort(loss)[::-1][:k]
    return float(hard.mean()) if hard.size else 0.0


def _ref(preds, labels):
    if isinstance(preds, (tuple, list)):
        return sum(w * _ref_single(p, labels) for p, w in zip(preds, AUX_WEIGHTS))
    return _ref_single(preds, labels)


if __name__ == "__main__":
    key = jax.random.PRNGKey(0)
    k1, k2, k3, k4 = jax.random.split(key, 4)

    N, C, H, W = 2, 4, 16, 16
    logits = jax.random.normal(k1, (N, C, H, W), dtype=jnp.float32)
    aux_logits = jax.random.normal(k4, (N, C, H, W), dtype=jnp.float32)
    labels = jax.random.randint(k2, (N, H, W), 0, C, dtype=jnp.int32)
    # sprinkle some ignore_label pixels
    ignore_mask = jax.random.uniform(k3, (N, H, W)) < 0.1
    labels = jnp.where(ignore_mask, IGNORE_LABEL, labels)

    fn = jax.jit(ohem_cross_entropy)

    out_single = jax.block_until_ready(fn(logits, labels))
    out_tuple = jax.block_until_ready(fn((logits, aux_logits), labels))
    assert jnp.isfinite(out_single) and jnp.isfinite(out_tuple)

    ref_single = _ref(logits, labels)
    ref_tuple = _ref((logits, aux_logits), labels)
    assert abs(float(out_single) - ref_single) <= 1e-4 * max(1.0, abs(ref_single))
    assert abs(float(out_tuple) - ref_tuple) <= 1e-4 * max(1.0, abs(ref_tuple))

    print("KERNEL_OK")
</pallas_src>

<mosaic_0001>
module attributes {stable_mosaic.version = 11 : i64} {
  func.func @kernel(%arg0: i32, %arg1: i32, %arg2: memref<1x4x256xf32, #tpu.memory_space<vmem>>, %arg3: memref<1x1x256xi32, #tpu.memory_space<vmem>>, %arg4: memref<1x1x256xf32, #tpu.memory_space<vmem>>, %arg5: memref<1x1x1x128xf32, #tpu.memory_space<vmem>>) attributes {dimension_semantics = [#tpu.dimension_semantics<parallel>, #tpu.dimension_semantics<parallel>], iteration_bounds = array<i64: 2, 1>, scalar_prefetch = 0 : i64, scratch_operands = 0 : i64, tpu.core_type = #tpu.core_type<tc>, window_params = [{transform_indices = @transform_0, window_bounds = array<i64: 1, 4, 256>}, {transform_indices = @transform_1, window_bounds = array<i64: 1, 1, 256>}, {transform_indices = @transform_2, window_bounds = array<i64: 1, 1, 256>}, {transform_indices = @transform_3, window_bounds = array<i64: 1, 1, 1, 128>}]} {
    %c0 = arith.constant 0 : index
    %c0_0 = arith.constant 0 : index
    %c0_1 = arith.constant 0 : index
    %0 = vector.load %arg2[%c0, %c0_0, %c0_1] : memref<1x4x256xf32, #tpu.memory_space<vmem>>, vector<1x4x256xf32>
    %c0_2 = arith.constant 0 : index
    %c0_3 = arith.constant 0 : index
    %c0_4 = arith.constant 0 : index
    %1 = vector.load %arg3[%c0_2, %c0_3, %c0_4] : memref<1x1x256xi32, #tpu.memory_space<vmem>>, vector<1x1x256xi32>
    %cst = arith.constant dense<0xFF800000> : vector<1x256xf32>
    %2 = vector.multi_reduction <maximumf>, %0, %cst [1] : vector<1x4x256xf32> to vector<1x256xf32>
    %3 = vector.shape_cast %2 : vector<1x256xf32> to vector<1x1x256xf32>
    %4 = vector.broadcast %3 : vector<1x1x256xf32> to vector<1x4x256xf32>
    %5 = arith.subf %0, %4 : vector<1x4x256xf32>
    %6 = math.exp %5 : vector<1x4x256xf32>
    %cst_5 = arith.constant dense<0.000000e+00> : vector<1x256xf32>
    %7 = vector.multi_reduction <add>, %6, %cst_5 [1] : vector<1x4x256xf32> to vector<1x256xf32>
    %8 = vector.shape_cast %7 : vector<1x256xf32> to vector<1x1x256xf32>
    %9 = math.log %8 : vector<1x1x256xf32>
    %10 = arith.addf %3, %9 : vector<1x1x256xf32>
    %11 = tpu.iota {dimensions = array<i32: 1>} : vector<1x4x256xi32>
    %12 = vector.broadcast %1 : vector<1x1x256xi32> to vector<1x4x256xi32>
    %13 = arith.cmpi eq, %11, %12 : vector<1x4x256xi32>
    %14 = arith.extui %13 : vector<1x4x256xi1> to vector<1x4x256xi32>
    %15 = arith.sitofp %14 : vector<1x4x256xi32> to vector<1x4x256xf32>
    %16 = arith.mulf %0, %15 : vector<1x4x256xf32>
    %cst_6 = arith.constant dense<0.000000e+00> : vector<1x256xf32>
    %17 = vector.multi_reduction <add>, %16, %cst_6 [1] : vector<1x4x256xf32> to vector<1x256xf32>
    %18 = vector.shape_cast %17 : vector<1x256xf32> to vector<1x1x256xf32>
    %19 = tpu.iota {dimensions = array<i32: 2>} : vector<1x1x256xi32>
    %c256_i32 = arith.constant 256 : i32
    %20 = arith.muli %arg1, %c256_i32 : i32
    %21 = vector.broadcast %20 : i32 to vector<1x1x256xi32>
    %22 = arith.addi %19, %21 : vector<1x1x256xi32>
    %c255_i32 = arith.constant 255 : i32
    %23 = vector.broadcast %c255_i32 : i32 to vector<1x1x256xi32>
    %24 = arith.cmpi ne, %1, %23 : vector<1x1x256xi32>
    %c256_i32_7 = arith.constant 256 : i32
    %25 = vector.broadcast %c256_i32_7 : i32 to vector<1x1x256xi32>
    %26 = arith.cmpi slt, %22, %25 : vector<1x1x256xi32>
    %27 = arith.andi %24, %26 : vector<1x1x256xi1>
    %28 = arith.subf %10, %18 : vector<1x1x256xf32>
    %cst_8 = arith.constant 0.000000e+00 : f32
    %29 = vector.broadcast %cst_8 : f32 to vector<1x1x256xf32>
    %30 = arith.select %27, %28, %29 : vector<1x1x256xi1>, vector<1x1x256xf32>
    %c0_9 = arith.constant 0 : index
    %c0_10 = arith.constant 0 : index
    %c0_11 = arith.constant 0 : index
    %31 = vector.load %arg4[%c0_9, %c0_10, %c0_11] : memref<1x1x256xf32, #tpu.memory_space<vmem>>, vector<1x1x256xf32>
    tpu.vector_store %arg4[%c0_9, %c0_10, %c0_11], %30 {strides = array<i32>} : memref<1x1x256xf32, #tpu.memory_space<vmem>>, vector<1x1x256xf32>,
    %cst_12 = arith.constant 0.356674939 : f32
    %32 = vector.broadcast %cst_12 : f32 to vector<1x1x256xf32>
    %33 = arith.cmpf ogt, %30, %32 : vector<1x1x256xf32>
    %34 = arith.andi %27, %33 : vector<1x1x256xi1>
    %35 = arith.extui %27 : vector<1x1x256xi1> to vector<1x1x256xi32>
    %36 = arith.sitofp %35 : vector<1x1x256xi32> to vector<1x1x256xf32>
    %37 = vector.shape_cast %36 : vector<1x1x256xf32> to vector<1x1x1x256xf32>
    %cst_13 = arith.constant dense<0.000000e+00> : vector<1xf32>
    %38 = vector.multi_reduction <add>, %37, %cst_13 [1, 2, 3] : vector<1x1x1x256xf32> to vector<1xf32>
    %39 = vector.shape_cast %38 : vector<1xf32> to vector<1x1x1x1xf32>
    %40 = vector.extract %39[0, 0, 0, 0] : f32 from vector<1x1x1x1xf32>
    %41 = arith.extui %34 : vector<1x1x256xi1> to vector<1x1x256xi32>
    %42 = arith.sitofp %41 : vector<1x1x256xi32> to vector<1x1x256xf32>
    %43 = vector.shape_cast %42 : vector<1x1x256xf32> to vector<1x1x1x256xf32>
    %cst_14 = arith.constant dense<0.000000e+00> : vector<1xf32>
    %44 = vector.multi_reduction <add>, %43, %cst_14 [1, 2, 3] : vector<1x1x1x256xf32> to vector<1xf32>
    %45 = vector.shape_cast %44 : vector<1xf32> to vector<1x1x1x1xf32>
    %46 = vector.extract %45[0, 0, 0, 0] : f32 from vector<1x1x1x1xf32>
    %cst_15 = arith.constant 0.000000e+00 : f32
    %47 = vector.broadcast %cst_15 : f32 to vector<1x1x256xf32>
    %48 = arith.select %34, %30, %47 : vector<1x1x256xi1>, vector<1x1x256xf32>
    %49 = vector.shape_cast %48 : vector<1x1x256xf32> to vector<1x1x1x256xf32>
    %cst_16 = arith.constant dense<0.000000e+00> : vector<1xf32>
    %50 = vector.multi_reduction <add>, %49, %cst_16 [1, 2, 3] : vector<1x1x1x256xf32> to vector<1xf32>
    %51 = vector.shape_cast %50 : vector<1xf32> to vector<1x1x1x1xf32>
    %52 = vector.extract %51[0, 0, 0, 0] : f32 from vector<1x1x1x1xf32>
    %53 = tpu.iota {dimensions = array<i32: 3>} : vector<1x1x1x128xi32>
    %c0_i32 = arith.constant 0 : i32
    %54 = vector.broadcast %c0_i32 : i32 to vector<1x1x1x128xi32>
    %55 = arith.cmpi eq, %53, %54 : vector<1x1x1x128xi32>
    %c1_i32 = arith.constant 1 : i32
    %56 = vector.broadcast %c1_i32 : i32 to vector<1x1x1x128xi32>
    %57 = arith.cmpi eq, %53, %56 : vector<1x1x1x128xi32>
    %c2_i32 = arith.constant 2 : i32
    %58 = vector.broadcast %c2_i32 : i32 to vector<1x1x1x128xi32>
    %59 = arith.cmpi eq, %53, %58 : vector<1x1x1x128xi32>
    %cst_17 = arith.constant 0.000000e+00 : f32
    %60 = vector.broadcast %52 : f32 to vector<1x1x1x128xf32>
    %61 = vector.broadcast %cst_17 : f32 to vector<1x1x1x128xf32>
    %62 = arith.select %59, %60, %61 : vector<1x1x1x128xi1>, vector<1x1x1x128xf32>
    %63 = vector.broadcast %46 : f32 to vector<1x1x1x128xf32>
    %64 = arith.select %57, %63, %62 : vector<1x1x1x128xi1>, vector<1x1x1x128xf32>
    %65 = vector.broadcast %40 : f32 to vector<1x1x1x128xf32>
    %66 = arith.select %55, %65, %64 : vector<1x1x1x128xi1>, vector<1x1x1x128xf32>
    %c0_18 = arith.constant 0 : index
    %c0_19 = arith.constant 0 : index
    %c0_20 = arith.constant 0 : index
    %c0_21 = arith.constant 0 : index
    %67 = vector.load %arg5[%c0_18, %c0_19, %c0_20, %c0_21] : memref<1x1x1x128xf32, #tpu.memory_space<vmem>>, vector<1x1x1x128xf32>
    tpu.vector_store %arg5[%c0_18, %c0_19, %c0_20, %c0_21], %66 {strides = array<i32>} : memref<1x1x1x128xf32, #tpu.memory_space<vmem>>, vector<1x1x1x128xf32>,
    return
  }
  func.func @transform_0(%arg0: i32, %arg1: i32) -> (i32, i32, i32) {
    %c0_i32 = arith.constant 0 : i32
    %c0_i32_0 = arith.constant 0 : i32
    return %arg0, %c0_i32, %arg1 : i32, i32, i32
  }
  func.func @transform_1(%arg0: i32, %arg1: i32) -> (i32, i32, i32) {
    %c0_i32 = arith.constant 0 : i32
    %c0_i32_0 = arith.constant 0 : i32
    return %arg0, %c0_i32, %arg1 : i32, i32, i32
  }
  func.func @transform_2(%arg0: i32, %arg1: i32) -> (i32, i32, i32) {
    %c0_i32 = arith.constant 0 : i32
    %c0_i32_0 = arith.constant 0 : i32
    return %arg0, %c0_i32, %arg1 : i32, i32, i32
  }
  func.func @transform_3(%arg0: i32, %arg1: i32) -> (i32, i32, i32, i32) {
    %c0_i32 = arith.constant 0 : i32
    %c0_i32_0 = arith.constant 0 : i32
    %c0_i32_1 = arith.constant 0 : i32
    return %arg0, %arg1, %c0_i32, %c0_i32_0 : i32, i32, i32, i32
  }
}

</mosaic_0001>

<bundles_post_ra>
// kernel: ohem_cross_entropy.1
= control target key start
LH: loop header
LB: loop body
LE: loop exit
PB: predicated region body
PF: predicated region fallthrough
CT: control target
= control target key end

     0   :  { %s722_s12 = smov 0   ;;  %s724_s13 = smov 0   ;;  %s817_s0 = inlined_call_operand.vmem [shape: f32[2,4,256], index: 0, kind: input, shape index: {}]   ;;  %s818_s1 = inlined_call_operand.vmem [shape: s32[2,1,256], index: 1, kind: input, shape index: {}]   ;;  %s819_s2 = inlined_call_operand.vmem [shape: f32[2,1,256], index: 2, kind: output, shape index: {0}]   ;;  %s820_s3 = inlined_call_operand.vmem [shape: f32[2,1,1,128], index: 3, kind: output, shape index: {1}]  }
   0x1   :  { %s726_s14 = smov 0  }
   0x2 LB: > { %s26_s15 = sadd.s32 1, %s693_s13  ;;  %p623_p0 = scmp.ge.s32.totalorder %s697_s14, 1  ;;  %s697_s14 = sphi %s726_s14, %s14_s14   ;;  %s693_s13 = sphi %s724_s13, %s824_s13   ;;  %s689_s12 = sphi %s722_s12, %s823_s12  }
   0x3   : > { %p28_p1 = scmp.ge.s32.totalorder %s26_s15, 2  ;;  %p179_p2 = scmp.lt.s32.totalorder %s697_s14, 3 }
   0x5   : > { %s826_s15 = smov (%p28_p1, %s26_s15), 0  ;;  %p180_p3 = pnand %p623_p0, %p179_p2 }
   0x6   : > { %p225_p4 = scmp.lt.s32.totalorder (!%p180_p3), %s689_s12, 1  ;;  %v308_v0 = vlaneseq (!%p180_p3)  ;;  %v699_v1 = vmov (!%p180_p3), 1966171168   ;;  %vm263_vm0 = vcmask (!%p180_p3), 1043456   ;;  %v700_v4 = vmov (!%p180_p3), 1  }
   0x7   : > { %183 = sbr.rel (%p180_p3) target bundleno = 307 (0x133), region = 28  ;;  %v360_v2 = vunpack.c.l.s4 (!%p180_p3), %v699_v1  ;;  %v358_v5 = vcombine.low (!%p180_p3), %v700_v4, %v700_v4  ;;  %v701_v23 = vmov (!%p180_p3), 0.0   ;;  %vm416_vm4 = vcmask (!%p180_p3), 1040384  }
   0x8   : > { %v309_v3 = vshrl.u32 (!%p180_p3), %v308_v0, 7  ;;  %vm398_vm7 = vcmp.lt.s32.totalorder (!%p180_p3), %v308_v0, 256 }
   0x9   : > { %v361_v6 = vunpack.c.0.s8 (!%p180_p3), %v360_v2 }
   0xa   : > { %v759_v19 = vsub.s32 (!%p180_p3), 0, %v309_v3  ;;  %v761_v20 = vsub.s32 (!%p180_p3), 1, %v309_v3 }
   0xb   : > { %v753_v7 = vsub.s32 (!%p180_p3), %v361_v6, %v309_v3 }
   0xd   : > { %v365_v11 = vrot.slane (!%p180_p3), %v358_v5, %v753_v7 }
   0xe   : > { %s828_s12 = smov (!%p225_p4, %s689_s12), 1 }
   0xf   : > { %s626_s16 = sshll.u32 %s828_s12, 1  ;;  %s634_s17 = sshll.u32 %s828_s12, 3  ;;  %v372_v15 = vrot.slane %v365_v11, %v753_v7 }
  0x10   : > { %s232_s20 = scalar_lea.vmem %s817_s0, %s634_s17  ;;  %s241_s23 = scalar_lea.vmem %s818_s1, %s626_s16 }
  0x11   : > { %v258_v8 = vld [vmem:[%s232_s20] sm:$0xff]  ;;  %vm373_vm2 = vcmp.ne.s32.totalorder %v372_v15, 0  ;;  %s250_s26 = scalar_lea.vmem %s819_s2, %s626_s16  ;;  %s257_s5 = scalar_lea.vmem %s820_s3, %s828_s12 }
  0x12   : > { %v261_v9 = vcombine.high %v258_v8, %v258_v8  ;;  %v264_v10 = vsel %vm263_vm0, %v258_v8, -inf  ;;  %v259_v13 = vld [vmem:[%s241_s23] sm:$0x3] }
  0x13   : > { %v265_v12 = vrot.slane %v264_v10, 4  ;;  %vm353_vm1 = vcmp.ne.s32.totalorder %v259_v13, 255  ;;  %v313_v36 = vrot.slane %v259_v13, %v759_v19  ;;  %v317_v37 = vrot.slane %v259_v13, %v761_v20 }
  0x14   : > { %v271_v14 = vsel %vm263_vm0, %v261_v9, -inf  ;;  %vm763_vm3 = vmand %vm353_vm1, %vm373_vm2 }
  0x15   : > { %v266_v16 = vmax.f32 %v264_v10, %v265_v12  ;;  %v272_v17 = vrot.slane %v271_v14, 4  ;;  %v630_v24 = vsel %vm763_vm3, 1.0, %v701_v23  ;;  %vm318_vm5 = vcmp.eq.s32.totalorder %v309_v3, %v313_v36 }
  0x16   : > { %v409_v26 = vrot.slane %v630_v24, %v759_v19  ;;  %v413_v27 = vrot.slane %v630_v24, %v761_v20  ;;  %vm319_vm6 = vcmp.eq.s32.totalorder %v309_v3, %v317_v37  ;;  %v628_v42 = vsel %vm318_vm5, 1.0, %v701_v23 }
  0x17   : > { %v267_v18 = vrot.slane %v266_v16, 2  ;;  %v273_v22 = vmax.f32 %v271_v14, %v272_v17  ;;  %v629_v43 = vsel %vm319_vm6, 1.0, %v701_v23 }
  0x18   : > { %v417_v30 = vsel %vm416_vm4, %v409_v26, 0.0  ;;  %v418_v31 = vsel %vm416_vm4, %v413_v27, 0.0  ;;  %v326_v44 = vcombine.low %v628_v42, %v629_v43 }
  0x19   : > { %v268_v25 = vmax.f32 %v266_v16, %v267_v18  ;;  %v274_v28 = vrot.slane %v273_v22, 2  ;;  %v419_v33 = vadd.f32 %v418_v31, %v417_v30 }
  0x1a   : > { %v328_v45 = vmul.f32 %v326_v44, %v258_v8 }
  0x1b   : > { %v269_v29 = vrot.slane %v268_v25, 1  ;;  %v275_v32 = vmax.f32 %v273_v22, %v274_v28  ;;  %420 = vadd.xlane.f32.xlu0 %v419_v33 }
  0x1c   : > { %v330_v47 = vcombine.high %v328_v45, %v328_v45  ;;  %v332_v50 = vsel %vm263_vm0, %v328_v45, 0.0 }
  0x1d   : > { %v270_v34 = vmax.f32 %v268_v25, %v269_v29  ;;  %v276_v35 = vrot.slane %v275_v32, 1  ;;  %v333_v56 = vrot.slane %v332_v50, 4 }
  0x1e   : > { %v339_v53 = vsel %vm263_vm0, %v330_v47, 0.0 }
  0x1f   : > { %v277_v38 = vmax.f32 %v275_v32, %v276_v35  ;;  %v340_v59 = vrot.slane %v339_v53, 4  ;;  %v334_v62 = vadd.f32 %v333_v56, %v332_v50 }
  0x21   : > { %v280_v39 = vcombine.low %v270_v34, %v277_v38  ;;  %v341_v2 = vadd.f32 %v340_v59, %v339_v53  ;;  %v335_v5 = vrot.slane %v334_v62, 2  ;;  %v347_v59 = vand.u32 127, %v308_v0 }
  0x23   : > { %v282_v40 = vsub.f32 %v258_v8, %v280_v39  ;;  %v342_v8 = vrot.slane %v341_v2, 2  ;;  %v336_v9 = vadd.f32 %v335_v5, %v334_v62  ;;  %vm480_vm10 = vcmp.eq.s32.totalorder %v347_v59, 2 }
  0x24   : > { %vm479_vm11 = vcmp.eq.s32.totalorder %v347_v59, 1  ;;  %vm478_vm12 = vcmp.eq.s32.totalorder %v347_v59, 0 }
  0x25   : > { %v283_v41 = vmul.f32 1.442695, %v282_v40  ;;  %v343_v10 = vadd.f32 %v342_v8, %v341_v2  ;;  %v337_v11 = vrot.slane %v336_v9, 1 }
  0x27   : > { %669 = vpow2.f32 %v283_v41  ;;  %v344_v12 = vrot.slane %v343_v10, 1  ;;  %v338_v15 = vadd.f32 %v337_v11, %v336_v9 }
  0x29   : > { %v345_v22 = vadd.f32 %v344_v12, %v343_v10 }
  0x31   : > { %v670_v46 = vpop.eup %669 }
  0x32   : > { %v286_v48 = vcombine.high %v670_v46, %v670_v46  ;;  %v288_v49 = vsel %vm263_vm0, %v670_v46, 0.0 }
  0x33   : > { %v289_v51 = vrot.slane %v288_v49, 4 }
  0x34   : > { %v295_v52 = vsel %vm263_vm0, %v286_v48, 0.0 }
  0x35   : > { %v290_v54 = vadd.f32 %v289_v51, %v288_v49  ;;  %v296_v55 = vrot.slane %v295_v52, 4 }
  0x37   : > { %v291_v57 = vrot.slane %v290_v54, 2  ;;  %v297_v58 = vadd.f32 %v296_v55, %v295_v52 }
  0x39   : > { %v292_v60 = vadd.f32 %v291_v57, %v290_v54  ;;  %v298_v61 = vrot.slane %v297_v58, 2 }
  0x3b   : > { %v293_v63 = vrot.slane %v292_v60, 1  ;;  %v299_v1 = vadd.f32 %v298_v61, %v297_v58 }
  0x3d   : > { %v294_v3 = vadd.f32 %v293_v63, %v292_v60  ;;  %v300_v4 = vrot.slane %v299_v1, 1 }
  0x3f   : > { %v301_v6 = vadd.f32 %v300_v4, %v299_v1  ;;  %671 = vlog2.f32 %v294_v3 }
  0x41   : > { %673 = vlog2.f32 %v301_v6 }
  0x49   : > { %v672_v13 = vpop.eup %671 }
  0x4a   : > { %v303_v14 = vmul.f32 0.6931472, %v672_v13 }
  0x4b   : > { %v674_v16 = vpop.eup %673 }
  0x4c   : > { %v305_v17 = vmul.f32 0.6931472, %v674_v16  ;;  %v306_v18 = vadd.f32 %v303_v14, %v270_v34 }
  0x4e   : > { %v307_v24 = vadd.f32 %v305_v17, %v277_v38  ;;  %v375_v25 = vsub.f32 %v306_v18, %v338_v15 }
  0x50   : > { %v376_v26 = vsub.f32 %v307_v24, %v345_v22 }
  0x52   : > { %v379_v27 = vcombine.low %v375_v25, %v376_v26 }
  0x54   : > { %v386_v28 = vrot.slane %v379_v27, %v753_v7 }
  0x56   : > { %v393_v29 = vrot.slane %v386_v28, %v753_v7 }
  0x58   : > { %v395_v30 = vsel %vm763_vm3, %v393_v29, 0.0 }
  0x59   : > { %vm401_vm8 = vcmp.gt.f32.partialorder %v395_v30, 0.35667494  ;;  %400 = vst.msk [vmem:[%s250_s26] sm:$0x3] %vm398_vm7, %v395_v30 }
  0x5a   : > { %vm402_vm9 = vmand %vm763_vm3, %vm401_vm8 }
  0x5b   : > { %v454_v31 = vsel %vm402_vm9, %v395_v30, 0.0  ;;  %v631_v32 = vsel %vm402_vm9, 1.0, %v701_v23 }
  0x5c   : > { %v459_v33 = vrot.slane %v454_v31, %v759_v19  ;;  %v463_v34 = vrot.slane %v454_v31, %v761_v20  ;;  %v435_v35 = vrot.slane %v631_v32, %v759_v19  ;;  %v439_v7 = vrot.slane %v631_v32, %v761_v20 }
  0x5e   : > { %v466_v36 = vsel %vm416_vm4, %v459_v33, 0.0  ;;  %v467_v37 = vsel %vm416_vm4, %v463_v34, 0.0  ;;  %v442_v38 = vsel %vm416_vm4, %v435_v35, 0.0  ;;  %v443_v21 = vsel %vm416_vm4, %v439_v7, 0.0 }
  0x5f   : > { %v468_v39 = vadd.f32 %v467_v37, %v466_v36  ;;  %v444_v40 = vadd.f32 %v443_v21, %v442_v38 }
  0x61   : > { %469 = vadd.xlane.f32.xlu1 %v468_v39  ;;  %445 = vadd.xlane.f32.xlu0 %v444_v40 }
  0xa8   : > { %v421_v23 = vpop.xlane.xlu0 %420 }
  0xa9   : > { %v422_v41 = vrot.slane %v421_v23, 4 }
  0xab   : > { %v423_v42 = vadd.f32 %v422_v41, %v421_v23 }
  0xad   : > { %v424_v43 = vrot.slane %v423_v42, 2 }
  0xaf   : > { %v425_v44 = vadd.f32 %v424_v43, %v423_v42 }
  0xb1   : > { %v426_v19 = vrot.slane %v425_v44, 1 }
  0xb3   : > { %v427_v45 = vadd.f32 %v426_v19, %v425_v44 }
  0xb5   : > { %635 = vpush %v427_v45 }
  0xe6   : > { %s636_s27 = spop %635 }
  0xe7   : > { %v485_v63 = vstv %s636_s27 }
  0xee   : > { %v470_v20 = vpop.xlane.xlu1 %469  ;;  %v446_v46 = vpop.xlane.xlu0 %445 }
  0xef   : > { %v471_v47 = vrot.slane %v470_v20, 4  ;;  %v447_v48 = vrot.slane %v446_v46, 4 }
  0xf1   : > { %v472_v49 = vadd.f32 %v471_v47, %v470_v20  ;;  %v448_v50 = vadd.f32 %v447_v48, %v446_v46 }
  0xf3   : > { %v473_v51 = vrot.slane %v472_v49, 2  ;;  %v449_v52 = vrot.slane %v448_v50, 2 }
  0xf5   : > { %v474_v53 = vadd.f32 %v473_v51, %v472_v49  ;;  %v450_v54 = vadd.f32 %v449_v52, %v448_v50 }
  0xf7   : > { %v451_v55 = vrot.slane %v450_v54, 1  ;;  %v475_v56 = vrot.slane %v474_v53, 1 }
  0xf9   : > { %v452_v57 = vadd.f32 %v451_v55, %v450_v54  ;;  %v476_v58 = vadd.f32 %v475_v56, %v474_v53 }
  0xfb   : > { %637 = vpush %v452_v57 }
  0xfc   : > { %639 = vpush %v476_v58 }
 0x12c   : > { %s638_s28 = spop %637 }
 0x12d   : > { %v483_v60 = vstv %s638_s28  ;;  %s640_s29 = spop %639 }
 0x12e   : > { %v481_v61 = vstv %s640_s29 }
 0x12f   : > { %v482_v62 = vsel %vm480_vm10, %v481_v61, 0.0 }
 0x130   : > { %v484_v1 = vsel %vm479_vm11, %v483_v60, %v482_v62 }
 0x131   : > { %v486_v2 = vsel %vm478_vm12, %v485_v63, %v484_v1 }
 0x132   : > { %487 = vst [vmem:[%s257_s5] sm:$0x1] %v486_v2 }
 0x133 PF: > { %s14_s14 = sadd.s32 1, %s697_s14   ;;  %s823_s12 = smov %s693_s13 }
 0x134   : > { %p11_p5 = scmp.ge.s32.totalorder %s14_s14, 4   ;;  %s824_s13 = smov %s826_s15 }
 0x136   :  { %13 = sbr.rel (!%p11_p5) target bundleno = 2 (0x2), region = 73 }

</bundles_post_ra>
